<compile_context>
chip_gen: v5e
topology: v5e:2x2
jax: 0.10.0
libtpu: 0.0.40
codegen_flags: <defaults>
</compile_context>

<pallas_src>
import functools

import jax
import jax.numpy as jnp
from jax.experimental import pallas as pl
from jax.experimental.pallas import tpu as pltpu


def _softmax_last(x):
    """Stable softmax over the last axis; divide via EUP approx reciprocal."""
    m = jnp.max(x, axis=-1, keepdims=True)
    e = jnp.exp(x - m)
    return e * pl.reciprocal(jnp.sum(e, axis=-1, keepdims=True), approx=True)


def tpt_cross_attn_kernel(hs_ref, kv_ref, pb_ref, ln_w_ref,
                          wq_ref, wk_ref, wv_ref, wr_ref, br_ref,
                          Rn_ref, wo_ref, out_ref, ctx_ref,
                          *, n_heads, d_kv, num_roles, eps, compute_dtype):
    f32 = jnp.float32

    x = hs_ref[0]                        # (TQ, D) f32 residual-stream tile
    kvx = kv_ref[0]                      # (K, D)  f32 encoder states

    # --- T5LayerNorm: x * rsqrt(mean(x^2) + eps) * weight (no mean subtraction) ---
    var = jnp.mean(x * x, axis=-1, keepdims=True)
    nx = x * jax.lax.rsqrt(var + eps) * ln_w_ref[0]                       # (TQ, D) f32

    nx_c = nx.astype(compute_dtype)
    kv_c = kvx.astype(compute_dtype)

    # --- packed projections: low-precision MXU inputs, f32 accumulation ---
    q = jnp.dot(nx_c, wq_ref[...], preferred_element_type=f32)            # (TQ, H*Dkv)
    k = jnp.dot(kv_c, wk_ref[...], preferred_element_type=f32)            # (K,  H*Dkv)
    v = jnp.dot(kv_c, wv_ref[...], preferred_element_type=f32)            # (K,  H*Dkv)
    rs = jnp.dot(nx_c, wr_ref[...], preferred_element_type=f32) + br_ref[...]  # (TQ, H*R)

    # --- head-major split: static lane slices + leading-axis stack ---
    def split_heads(t, w, dtype):
        return jnp.stack(
            [t[:, h * w:(h + 1) * w].astype(dtype) for h in range(n_heads)], axis=0)

    q3 = split_heads(q, d_kv, compute_dtype)      # (H, TQ, Dkv)
    k3 = split_heads(k, d_kv, compute_dtype)      # (H, K,  Dkv)
    v3 = split_heads(v, d_kv, compute_dtype)      # (H, K,  Dkv)
    rs3 = split_heads(rs, num_roles, f32)         # (H, TQ, R)

    # --- T5-style attention, batched over heads (no 1/sqrt(d), additive bias) ---
    s = jnp.einsum('hqd,hkd->hqk', q3, k3, preferred_element_type=f32)     # (H, TQ, K)
    s = s + pb_ref[0]
    w = _softmax_last(s)                                                    # f32
    v_bar = jnp.einsum('hqk,hkd->hqd', w.astype(compute_dtype), v3,
                       preferred_element_type=f32)                          # (H, TQ, Dkv)

    # --- discrete roles (shared role matrix, row-normalized in the wrapper) ---
    rw = _softmax_last(rs3)                                                 # (H, TQ, R)
    tq = rw.shape[1]
    # leading-dim flatten (TQ is a multiple of 8 -> layout-preserving reshape)
    sel = jnp.dot(rw.reshape(n_heads * tq, num_roles).astype(compute_dtype),
                  Rn_ref[...], preferred_element_type=f32)                  # (H*TQ, Dkv)
    sel = sel.reshape(n_heads, tq, d_kv)                                    # (H, TQ, Dkv)

    # hadamard TPR binding, context = tpr + v_bar = v_bar * (sel + 1)
    ctx = v_bar * (sel + 1.0)                                               # (H, TQ, Dkv) f32

    # --- unshape: assemble lane-dense (TQ, H*Dkv) context in VMEM scratch ---
    for h in range(n_heads):
        ctx_ref[:, h * d_kv:(h + 1) * d_kv] = ctx[h].astype(ctx_ref.dtype)

    # --- output projection + residual (dropout identity in eval mode) ---
    y = jnp.dot(ctx_ref[...], wo_ref[...], preferred_element_type=f32)      # (TQ, D)
    out_ref[0] = x + y


def tpt_layer_cross_attention(hidden_states, kv, position_bias, params, *,
                              n_heads, d_kv, num_roles, eps=1e-6,
                              q_block=256, compute_dtype=jnp.bfloat16):
    B, Q, D = hidden_states.shape
    K = kv.shape[1]
    inner = n_heads * d_kv

    # Q tiling: biggest clean tile (falls back to the full sequence if q_block
    # does not divide Q; typical Q values are multiples of q_block).
    tq = q_block if (Q % q_block == 0) else Q
    n_q_tiles = Q // tq

    # --- fold per-call constants in the wrapper (free, done once) ---
    Rm = params["R"].astype(jnp.float32)
    Rn = (Rm / jnp.sqrt(jnp.sum(Rm * Rm, axis=1, keepdims=True))).astype(compute_dtype)
    ln_w = params["ln_w"].astype(jnp.float32)
    br = params["br"].astype(jnp.float32)
    wq = params["wq"].astype(compute_dtype)
    wk = params["wk"].astype(compute_dtype)
    wv = params["wv"].astype(compute_dtype)
    wr = params["wr"].astype(compute_dtype)
    wo = params["wo"].astype(compute_dtype)

    kernel = functools.partial(tpt_cross_attn_kernel, n_heads=n_heads, d_kv=d_kv,
                               num_roles=num_roles, eps=eps,
                               compute_dtype=compute_dtype)

    # Constant weights: whole array, single-buffered, resident in VMEM
    # (no per-grid-step DMA, no double buffer).
    vmem = pl.BlockSpec(memory_space=pltpu.MemorySpace.VMEM)

    return pl.pallas_call(
        kernel,
        out_shape=jax.ShapeDtypeStruct((B, Q, D), jnp.float32),
        grid=(B, n_q_tiles),
        in_specs=[
            pl.BlockSpec((1, tq, D), lambda b, qi: (b, qi, 0)),              # hidden_states
            pl.BlockSpec((1, K, D), lambda b, qi: (b, 0, 0)),                # kv (reused across q tiles)
            pl.BlockSpec((1, n_heads, tq, K), lambda b, qi: (0, 0, qi, 0)),  # position_bias
            vmem,   # ln_w  (1, D)
            vmem,   # wq    (D, H*Dkv)
            vmem,   # wk    (D, H*Dkv)
            vmem,   # wv    (D, H*Dkv)
            vmem,   # wr    (D, H*R)
            vmem,   # br    (1, H*R)
            vmem,   # Rn    (R, Dkv)   row-normalized role matrix
            vmem,   # wo    (H*Dkv, D)
        ],
        out_specs=pl.BlockSpec((1, tq, D), lambda b, qi: (b, qi, 0)),
        scratch_shapes=[pltpu.VMEM((tq, inner), compute_dtype)],             # ctx assembly
        compiler_params=pltpu.CompilerParams(
            dimension_semantics=("parallel", "parallel"),
            vmem_limit_bytes=48 * 1024 * 1024),
    )(hidden_states, kv, position_bias, ln_w, wq, wk, wv, wr, br, Rn, wo)


def reference(hidden_states, kv, position_bias, params,
              *, n_heads, d_kv, num_roles, eps=1e-6):
    """Pure-JAX (f32) reference mirroring the PyTorch forward semantics."""
    x = hidden_states
    B, Q, D = x.shape
    K = kv.shape[1]
    var = jnp.mean(x * x, axis=-1, keepdims=True)
    nx = x * jax.lax.rsqrt(var + eps) * params["ln_w"][0]
    q = (nx @ params["wq"]).reshape(B, Q, n_heads, d_kv).transpose(0, 2, 1, 3)
    k = (kv @ params["wk"]).reshape(B, K, n_heads, d_kv).transpose(0, 2, 1, 3)
    v = (kv @ params["wv"]).reshape(B, K, n_heads, d_kv).transpose(0, 2, 1, 3)
    scores = jnp.einsum('bnqd,bnkd->bnqk', q, k) + position_bias
    w = jax.nn.softmax(scores, axis=-1)
    v_bar = jnp.einsum('bnqk,bnkd->bnqd', w, v)
    rs = (nx @ params["wr"] + params["br"][0]).reshape(
        B, Q, n_heads, num_roles).transpose(0, 2, 1, 3)
    rw = jax.nn.softmax(rs, axis=-1)
    Rm = params["R"]
    role_matrix = Rm / jnp.linalg.norm(Rm, axis=1, keepdims=True)
    sel = rw @ role_matrix
    ctx = (v_bar * sel + v_bar).transpose(0, 2, 1, 3).reshape(B, Q, n_heads * d_kv)
    return x + ctx @ params["wo"]


if __name__ == "__main__":
    # small config
    B, Q, K = 2, 8, 8
    D = 32              # d_model
    H = 4               # num_heads
    DKV = 8             # d_kv
    R = 4               # num_roles
    INNER = H * DKV

    key = jax.random.PRNGKey(0)
    ks = jax.random.split(key, 12)

    params = {
        "ln_w": 1.0 + 0.1 * jax.random.normal(ks[0], (1, D), jnp.float32),
        "wq":   0.1 * jax.random.normal(ks[1], (D, INNER), jnp.float32),
        "wk":   0.1 * jax.random.normal(ks[2], (D, INNER), jnp.float32),
        "wv":   0.1 * jax.random.normal(ks[3], (D, INNER), jnp.float32),
        "wr":   0.1 * jax.random.normal(ks[4], (D, H * R), jnp.float32),
        "br":   0.1 * jax.random.normal(ks[5], (1, H * R), jnp.float32),
        "R":    0.3 * jax.random.normal(ks[6], (R, DKV), jnp.float32),   # xavier-ish
        "wo":   0.1 * jax.random.normal(ks[7], (INNER, D), jnp.float32),
    }

    hidden_states = jax.random.normal(ks[8], (B, Q, D), jnp.float32)
    kv = jax.random.normal(ks[9], (B, K, D), jnp.float32)
    position_bias = 0.1 * jax.random.normal(ks[10], (1, H, Q, K), jnp.float32)

    out = tpt_layer_cross_attention(hidden_states, kv, position_bias, params,
                                    n_heads=H, d_kv=DKV, num_roles=R)
    out = jax.block_until_ready(out)

    ref = reference(hidden_states, kv, position_bias, params,
                    n_heads=H, d_kv=DKV, num_roles=R)
    assert out.shape == (B, Q, D)
    # bf16 MXU inputs (f32 accumulation) + approximate reciprocal -> loosened tolerance.
    assert jnp.allclose(out, ref, rtol=3e-2, atol=3e-2), (
        "mismatch vs JAX reference; max abs diff = "
        f"{float(jnp.max(jnp.abs(out - ref)))}")

    print("KERNEL_OK")
</pallas_src>

<mosaic_0001>
module attributes {stable_mosaic.version = 11 : i64} {
  func.func @tpt_cross_attn_kernel(%arg0: i32, %arg1: i32, %arg2: memref<1x8x32xf32, #tpu.memory_space<vmem>>, %arg3: memref<1x8x32xf32, #tpu.memory_space<vmem>>, %arg4: memref<1x4x8x8xf32, #tpu.memory_space<vmem>>, %arg5: memref<1x32xf32, #tpu.memory_space<vmem>>, %arg6: memref<32x32xbf16, #tpu.memory_space<vmem>>, %arg7: memref<32x32xbf16, #tpu.memory_space<vmem>>, %arg8: memref<32x32xbf16, #tpu.memory_space<vmem>>, %arg9: memref<32x16xbf16, #tpu.memory_space<vmem>>, %arg10: memref<1x16xf32, #tpu.memory_space<vmem>>, %arg11: memref<4x8xbf16, #tpu.memory_space<vmem>>, %arg12: memref<32x32xbf16, #tpu.memory_space<vmem>>, %arg13: memref<1x8x32xf32, #tpu.memory_space<vmem>>, %arg14: memref<8x32xbf16, #tpu.memory_space<vmem>>) attributes {dimension_semantics = [#tpu.dimension_semantics<parallel>, #tpu.dimension_semantics<parallel>], iteration_bounds = array<i64: 2, 1>, scalar_prefetch = 0 : i64, scratch_operands = 1 : i64, tpu.core_type = #tpu.core_type<tc>, window_params = [{transform_indices = @transform_0, window_bounds = array<i64: 1, 8, 32>}, {transform_indices = @transform_1, window_bounds = array<i64: 1, 8, 32>}, {transform_indices = @transform_2, window_bounds = array<i64: 1, 4, 8, 8>}, {pipeline_mode = #tpu.pipeline_mode<synchronous>, transform_indices = @transform_3, window_bounds = array<i64: 1, 32>}, {pipeline_mode = #tpu.pipeline_mode<synchronous>, transform_indices = @transform_4, window_bounds = array<i64: 32, 32>}, {pipeline_mode = #tpu.pipeline_mode<synchronous>, transform_indices = @transform_5, window_bounds = array<i64: 32, 32>}, {pipeline_mode = #tpu.pipeline_mode<synchronous>, transform_indices = @transform_6, window_bounds = array<i64: 32, 32>}, {pipeline_mode = #tpu.pipeline_mode<synchronous>, transform_indices = @transform_7, window_bounds = array<i64: 32, 16>}, {pipeline_mode = #tpu.pipeline_mode<synchronous>, transform_indices = @transform_8, window_bounds = array<i64: 1, 16>}, {pipeline_mode = #tpu.pipeline_mode<synchronous>, transform_indices = @transform_9, window_bounds = array<i64: 4, 8>}, {pipeline_mode = #tpu.pipeline_mode<synchronous>, transform_indices = @transform_10, window_bounds = array<i64: 32, 32>}, {transform_indices = @transform_11, window_bounds = array<i64: 1, 8, 32>}]} {
    %c0 = arith.constant 0 : index
    %c0_0 = arith.constant 0 : index
    %c0_1 = arith.constant 0 : index
    %0 = vector.load %arg2[%c0, %c0_0, %c0_1] : memref<1x8x32xf32, #tpu.memory_space<vmem>>, vector<1x8x32xf32>
    %1 = vector.shape_cast %0 : vector<1x8x32xf32> to vector<8x32xf32>
    %c0_2 = arith.constant 0 : index
    %c0_3 = arith.constant 0 : index
    %c0_4 = arith.constant 0 : index
    %2 = vector.load %arg3[%c0_2, %c0_3, %c0_4] : memref<1x8x32xf32, #tpu.memory_space<vmem>>, vector<1x8x32xf32>
    %3 = vector.shape_cast %2 : vector<1x8x32xf32> to vector<8x32xf32>
    %4 = arith.mulf %1, %1 : vector<8x32xf32>
    %cst = arith.constant dense<0.000000e+00> : vector<8xf32>
    %5 = vector.multi_reduction <add>, %4, %cst [1] : vector<8x32xf32> to vector<8xf32>
    %6 = vector.shape_cast %5 : vector<8xf32> to vector<8x1xf32>
    %cst_5 = arith.constant 3.200000e+01 : f32
    %7 = vector.broadcast %cst_5 : f32 to vector<8x1xf32>
    %8 = arith.divf %6, %7 : vector<8x1xf32>
    %cst_6 = arith.constant 9.99999997E-7 : f32
    %9 = vector.broadcast %cst_6 : f32 to vector<8x1xf32>
    %10 = arith.addf %8, %9 : vector<8x1xf32>
    %11 = math.rsqrt %10 : vector<8x1xf32>
    %12 = vector.broadcast %11 : vector<8x1xf32> to vector<8x32xf32>
    %13 = arith.mulf %1, %12 : vector<8x32xf32>
    %c0_7 = arith.constant 0 : index
    %c0_8 = arith.constant 0 : index
    %14 = vector.load %arg5[%c0_7, %c0_8] : memref<1x32xf32, #tpu.memory_space<vmem>>, vector<1x32xf32>
    %15 = vector.shape_cast %14 : vector<1x32xf32> to vector<32xf32>
    %16 = vector.shape_cast %15 : vector<32xf32> to vector<1x32xf32>
    %17 = vector.broadcast %16 : vector<1x32xf32> to vector<8x32xf32>
    %18 = arith.mulf %13, %17 : vector<8x32xf32>
    %19 = arith.truncf %18 : vector<8x32xf32> to vector<8x32xbf16>
    %20 = arith.truncf %3 : vector<8x32xf32> to vector<8x32xbf16>
    %c0_9 = arith.constant 0 : index
    %c0_10 = arith.constant 0 : index
    %21 = vector.load %arg6[%c0_9, %c0_10] : memref<32x32xbf16, #tpu.memory_space<vmem>>, vector<32x32xbf16>
    %cst_11 = arith.constant dense<0.000000e+00> : vector<8x32xf32>
    %22 = tpu.matmul %19, %21, %cst_11 {dimension_numbers = #tpu.dot_dimension_numbers<[1], [0], [0], [1], [0, 0, 1, 1], [], []>} : vector<8x32xbf16>, vector<32x32xbf16>, vector<8x32xf32> -> vector<8x32xf32>
    %c0_12 = arith.constant 0 : index
    %c0_13 = arith.constant 0 : index
    %23 = vector.load %arg7[%c0_12, %c0_13] : memref<32x32xbf16, #tpu.memory_space<vmem>>, vector<32x32xbf16>
    %cst_14 = arith.constant dense<0.000000e+00> : vector<8x32xf32>
    %24 = tpu.matmul %20, %23, %cst_14 {dimension_numbers = #tpu.dot_dimension_numbers<[1], [0], [0], [1], [0, 0, 1, 1], [], []>} : vector<8x32xbf16>, vector<32x32xbf16>, vector<8x32xf32> -> vector<8x32xf32>
    %c0_15 = arith.constant 0 : index
    %c0_16 = arith.constant 0 : index
    %25 = vector.load %arg8[%c0_15, %c0_16] : memref<32x32xbf16, #tpu.memory_space<vmem>>, vector<32x32xbf16>
    %cst_17 = arith.constant dense<0.000000e+00> : vector<8x32xf32>
    %26 = tpu.matmul %20, %25, %cst_17 {dimension_numbers = #tpu.dot_dimension_numbers<[1], [0], [0], [1], [0, 0, 1, 1], [], []>} : vector<8x32xbf16>, vector<32x32xbf16>, vector<8x32xf32> -> vector<8x32xf32>
    %c0_18 = arith.constant 0 : index
    %c0_19 = arith.constant 0 : index
    %27 = vector.load %arg9[%c0_18, %c0_19] : memref<32x16xbf16, #tpu.memory_space<vmem>>, vector<32x16xbf16>
    %cst_20 = arith.constant dense<0.000000e+00> : vector<8x16xf32>
    %28 = tpu.matmul %19, %27, %cst_20 {dimension_numbers = #tpu.dot_dimension_numbers<[1], [0], [0], [1], [0, 0, 1, 1], [], []>} : vector<8x32xbf16>, vector<32x16xbf16>, vector<8x16xf32> -> vector<8x16xf32>
    %c0_21 = arith.constant 0 : index
    %c0_22 = arith.constant 0 : index
    %29 = vector.load %arg10[%c0_21, %c0_22] : memref<1x16xf32, #tpu.memory_space<vmem>>, vector<1x16xf32>
    %30 = vector.broadcast %29 : vector<1x16xf32> to vector<8x16xf32>
    %31 = arith.addf %28, %30 : vector<8x16xf32>
    %32 = vector.extract_strided_slice %22 {offsets = [0, 0], sizes = [8, 8], strides = [1, 1]} : vector<8x32xf32> to vector<8x8xf32>
    %33 = arith.truncf %32 : vector<8x8xf32> to vector<8x8xbf16>
    %34 = vector.extract_strided_slice %22 {offsets = [0, 8], sizes = [8, 8], strides = [1, 1]} : vector<8x32xf32> to vector<8x8xf32>
    %35 = arith.truncf %34 : vector<8x8xf32> to vector<8x8xbf16>
    %36 = vector.extract_strided_slice %22 {offsets = [0, 16], sizes = [8, 8], strides = [1, 1]} : vector<8x32xf32> to vector<8x8xf32>
    %37 = arith.truncf %36 : vector<8x8xf32> to vector<8x8xbf16>
    %38 = vector.extract_strided_slice %22 {offsets = [0, 24], sizes = [8, 8], strides = [1, 1]} : vector<8x32xf32> to vector<8x8xf32>
    %39 = arith.truncf %38 : vector<8x8xf32> to vector<8x8xbf16>
    %40 = vector.shape_cast %33 : vector<8x8xbf16> to vector<1x8x8xbf16>
    %41 = vector.shape_cast %35 : vector<8x8xbf16> to vector<1x8x8xbf16>
    %42 = vector.shape_cast %37 : vector<8x8xbf16> to vector<1x8x8xbf16>
    %43 = vector.shape_cast %39 : vector<8x8xbf16> to vector<1x8x8xbf16>
    %44 = tpu.concatenate %40, %41, %42, %43 in 0 : vector<1x8x8xbf16>, vector<1x8x8xbf16>, vector<1x8x8xbf16>, vector<1x8x8xbf16> -> vector<4x8x8xbf16>
    %45 = vector.extract_strided_slice %24 {offsets = [0, 0], sizes = [8, 8], strides = [1, 1]} : vector<8x32xf32> to vector<8x8xf32>
    %46 = arith.truncf %45 : vector<8x8xf32> to vector<8x8xbf16>
    %47 = vector.extract_strided_slice %24 {offsets = [0, 8], sizes = [8, 8], strides = [1, 1]} : vector<8x32xf32> to vector<8x8xf32>
    %48 = arith.truncf %47 : vector<8x8xf32> to vector<8x8xbf16>
    %49 = vector.extract_strided_slice %24 {offsets = [0, 16], sizes = [8, 8], strides = [1, 1]} : vector<8x32xf32> to vector<8x8xf32>
    %50 = arith.truncf %49 : vector<8x8xf32> to vector<8x8xbf16>
    %51 = vector.extract_strided_slice %24 {offsets = [0, 24], sizes = [8, 8], strides = [1, 1]} : vector<8x32xf32> to vector<8x8xf32>
    %52 = arith.truncf %51 : vector<8x8xf32> to vector<8x8xbf16>
    %53 = vector.shape_cast %46 : vector<8x8xbf16> to vector<1x8x8xbf16>
    %54 = vector.shape_cast %48 : vector<8x8xbf16> to vector<1x8x8xbf16>
    %55 = vector.shape_cast %50 : vector<8x8xbf16> to vector<1x8x8xbf16>
    %56 = vector.shape_cast %52 : vector<8x8xbf16> to vector<1x8x8xbf16>
    %57 = tpu.concatenate %53, %54, %55, %56 in 0 : vector<1x8x8xbf16>, vector<1x8x8xbf16>, vector<1x8x8xbf16>, vector<1x8x8xbf16> -> vector<4x8x8xbf16>
    %58 = vector.extract_strided_slice %26 {offsets = [0, 0], sizes = [8, 8], strides = [1, 1]} : vector<8x32xf32> to vector<8x8xf32>
    %59 = arith.truncf %58 : vector<8x8xf32> to vector<8x8xbf16>
    %60 = vector.extract_strided_slice %26 {offsets = [0, 8], sizes = [8, 8], strides = [1, 1]} : vector<8x32xf32> to vector<8x8xf32>
    %61 = arith.truncf %60 : vector<8x8xf32> to vector<8x8xbf16>
    %62 = vector.extract_strided_slice %26 {offsets = [0, 16], sizes = [8, 8], strides = [1, 1]} : vector<8x32xf32> to vector<8x8xf32>
    %63 = arith.truncf %62 : vector<8x8xf32> to vector<8x8xbf16>
    %64 = vector.extract_strided_slice %26 {offsets = [0, 24], sizes = [8, 8], strides = [1, 1]} : vector<8x32xf32> to vector<8x8xf32>
    %65 = arith.truncf %64 : vector<8x8xf32> to vector<8x8xbf16>
    %66 = vector.shape_cast %59 : vector<8x8xbf16> to vector<1x8x8xbf16>
    %67 = vector.shape_cast %61 : vector<8x8xbf16> to vector<1x8x8xbf16>
    %68 = vector.shape_cast %63 : vector<8x8xbf16> to vector<1x8x8xbf16>
    %69 = vector.shape_cast %65 : vector<8x8xbf16> to vector<1x8x8xbf16>
    %70 = tpu.concatenate %66, %67, %68, %69 in 0 : vector<1x8x8xbf16>, vector<1x8x8xbf16>, vector<1x8x8xbf16>, vector<1x8x8xbf16> -> vector<4x8x8xbf16>
    %71 = vector.extract_strided_slice %31 {offsets = [0, 0], sizes = [8, 4], strides = [1, 1]} : vector<8x16xf32> to vector<8x4xf32>
    %72 = vector.extract_strided_slice %31 {offsets = [0, 4], sizes = [8, 4], strides = [1, 1]} : vector<8x16xf32> to vector<8x4xf32>
    %73 = vector.extract_strided_slice %31 {offsets = [0, 8], sizes = [8, 4], strides = [1, 1]} : vector<8x16xf32> to vector<8x4xf32>
    %74 = vector.extract_strided_slice %31 {offsets = [0, 12], sizes = [8, 4], strides = [1, 1]} : vector<8x16xf32> to vector<8x4xf32>
    %75 = vector.shape_cast %71 : vector<8x4xf32> to vector<1x8x4xf32>
    %76 = vector.shape_cast %72 : vector<8x4xf32> to vector<1x8x4xf32>
    %77 = vector.shape_cast %73 : vector<8x4xf32> to vector<1x8x4xf32>
    %78 = vector.shape_cast %74 : vector<8x4xf32> to vector<1x8x4xf32>
    %79 = tpu.concatenate %75, %76, %77, %78 in 0 : vector<1x8x4xf32>, vector<1x8x4xf32>, vector<1x8x4xf32>, vector<1x8x4xf32> -> vector<4x8x4xf32>
    "tpu.trace_start"() <{level = 10 : i32, message = "hqd,hkd->hqk"}> : () -> ()
    %cst_23 = arith.constant dense<0.000000e+00> : vector<4x8x8xf32>
    %80 = tpu.matmul %44, %57, %cst_23 {dimension_numbers = #tpu.dot_dimension_numbers<[2], [2], [1], [1], [0, 0, 0, 1, 1, 1], [0], [0]>} : vector<4x8x8xbf16>, vector<4x8x8xbf16>, vector<4x8x8xf32> -> vector<4x8x8xf32>
    "tpu.trace_stop"() : () -> ()
    %c0_24 = arith.constant 0 : index
    %c0_25 = arith.constant 0 : index
    %c0_26 = arith.constant 0 : index
    %c0_27 = arith.constant 0 : index
    %81 = vector.load %arg4[%c0_24, %c0_25, %c0_26, %c0_27] : memref<1x4x8x8xf32, #tpu.memory_space<vmem>>, vector<1x4x8x8xf32>
    %82 = vector.shape_cast %81 : vector<1x4x8x8xf32> to vector<4x8x8xf32>
    %83 = arith.addf %80, %82 : vector<4x8x8xf32>
    %cst_28 = arith.constant dense<0xFF800000> : vector<4x8xf32>
    %84 = vector.multi_reduction <maximumf>, %83, %cst_28 [2] : vector<4x8x8xf32> to vector<4x8xf32>
    %85 = vector.shape_cast %84 : vector<4x8xf32> to vector<4x8x1xf32>
    %86 = vector.broadcast %85 : vector<4x8x1xf32> to vector<4x8x8xf32>
    %87 = arith.subf %83, %86 : vector<4x8x8xf32>
    %88 = math.exp %87 : vector<4x8x8xf32>
    %cst_29 = arith.constant dense<0.000000e+00> : vector<4x8xf32>
    %89 = vector.multi_reduction <add>, %88, %cst_29 [2] : vector<4x8x8xf32> to vector<4x8xf32>
    %90 = vector.shape_cast %89 : vector<4x8xf32> to vector<4x8x1xf32>
    %91 = tpu.reciprocal %90 {approx = true} : vector<4x8x1xf32> -> vector<4x8x1xf32>
    %92 = vector.broadcast %91 : vector<4x8x1xf32> to vector<4x8x8xf32>
    %93 = arith.mulf %88, %92 : vector<4x8x8xf32>
    %94 = arith.truncf %93 : vector<4x8x8xf32> to vector<4x8x8xbf16>
    "tpu.trace_start"() <{level = 10 : i32, message = "hqk,hkd->hqd"}> : () -> ()
    %cst_30 = arith.constant dense<0.000000e+00> : vector<4x8x8xf32>
    %95 = tpu.matmul %94, %70, %cst_30 {dimension_numbers = #tpu.dot_dimension_numbers<[2], [1], [1], [2], [0, 0, 0, 1, 1, 2], [0], [0]>} : vector<4x8x8xbf16>, vector<4x8x8xbf16>, vector<4x8x8xf32> -> vector<4x8x8xf32>
    "tpu.trace_stop"() : () -> ()
    %cst_31 = arith.constant dense<0xFF800000> : vector<4x8xf32>
    %96 = vector.multi_reduction <maximumf>, %79, %cst_31 [2] : vector<4x8x4xf32> to vector<4x8xf32>
    %97 = vector.shape_cast %96 : vector<4x8xf32> to vector<4x8x1xf32>
    %98 = vector.broadcast %97 : vector<4x8x1xf32> to vector<4x8x4xf32>
    %99 = arith.subf %79, %98 : vector<4x8x4xf32>
    %100 = math.exp %99 : vector<4x8x4xf32>
    %cst_32 = arith.constant dense<0.000000e+00> : vector<4x8xf32>
    %101 = vector.multi_reduction <add>, %100, %cst_32 [2] : vector<4x8x4xf32> to vector<4x8xf32>
    %102 = vector.shape_cast %101 : vector<4x8xf32> to vector<4x8x1xf32>
    %103 = tpu.reciprocal %102 {approx = true} : vector<4x8x1xf32> -> vector<4x8x1xf32>
    %104 = vector.broadcast %103 : vector<4x8x1xf32> to vector<4x8x4xf32>
    %105 = arith.mulf %100, %104 : vector<4x8x4xf32>
    %106 = vector.shape_cast %105 : vector<4x8x4xf32> to vector<32x4xf32>
    %107 = arith.truncf %106 : vector<32x4xf32> to vector<32x4xbf16>
    %c0_33 = arith.constant 0 : index
    %c0_34 = arith.constant 0 : index
    %108 = vector.load %arg11[%c0_33, %c0_34] : memref<4x8xbf16, #tpu.memory_space<vmem>>, vector<4x8xbf16>
    %cst_35 = arith.constant dense<0.000000e+00> : vector<32x8xf32>
    %109 = tpu.matmul %107, %108, %cst_35 {dimension_numbers = #tpu.dot_dimension_numbers<[1], [0], [0], [1], [0, 0, 1, 1], [], []>} : vector<32x4xbf16>, vector<4x8xbf16>, vector<32x8xf32> -> vector<32x8xf32>
    %110 = vector.shape_cast %109 : vector<32x8xf32> to vector<4x8x8xf32>
    %cst_36 = arith.constant 1.000000e+00 : f32
    %111 = vector.broadcast %cst_36 : f32 to vector<4x8x8xf32>
    %112 = arith.addf %110, %111 : vector<4x8x8xf32>
    %113 = arith.mulf %95, %112 : vector<4x8x8xf32>
    %114 = vector.extract_strided_slice %113 {offsets = [0, 0, 0], sizes = [1, 8, 8], strides = [1, 1, 1]} : vector<4x8x8xf32> to vector<1x8x8xf32>
    %115 = vector.shape_cast %114 : vector<1x8x8xf32> to vector<8x8xf32>
    %116 = arith.truncf %115 : vector<8x8xf32> to vector<8x8xbf16>
    %c0_37 = arith.constant 0 : index
    %c0_38 = arith.constant 0 : index
    %117 = vector.load %arg14[%c0_37, %c0_38] : memref<8x32xbf16, #tpu.memory_space<vmem>>, vector<8x8xbf16>
    tpu.vector_store %arg14[%c0_37, %c0_38], %116 {strides = array<i32>} : memref<8x32xbf16, #tpu.memory_space<vmem>>, vector<8x8xbf16>,
    %118 = vector.extract_strided_slice %113 {offsets = [1, 0, 0], sizes = [1, 8, 8], strides = [1, 1, 1]} : vector<4x8x8xf32> to vector<1x8x8xf32>
    %119 = vector.shape_cast %118 : vector<1x8x8xf32> to vector<8x8xf32>
    %120 = arith.truncf %119 : vector<8x8xf32> to vector<8x8xbf16>
    %c0_39 = arith.constant 0 : index
    %c8 = arith.constant 8 : index
    %121 = vector.load %arg14[%c0_39, %c8] : memref<8x32xbf16, #tpu.memory_space<vmem>>, vector<8x8xbf16>
    tpu.vector_store %arg14[%c0_39, %c8], %120 {strides = array<i32>} : memref<8x32xbf16, #tpu.memory_space<vmem>>, vector<8x8xbf16>,
    %122 = vector.extract_strided_slice %113 {offsets = [2, 0, 0], sizes = [1, 8, 8], strides = [1, 1, 1]} : vector<4x8x8xf32> to vector<1x8x8xf32>
    %123 = vector.shape_cast %122 : vector<1x8x8xf32> to vector<8x8xf32>
    %124 = arith.truncf %123 : vector<8x8xf32> to vector<8x8xbf16>
    %c0_40 = arith.constant 0 : index
    %c16 = arith.constant 16 : index
    %125 = vector.load %arg14[%c0_40, %c16] : memref<8x32xbf16, #tpu.memory_space<vmem>>, vector<8x8xbf16>
    tpu.vector_store %arg14[%c0_40, %c16], %124 {strides = array<i32>} : memref<8x32xbf16, #tpu.memory_space<vmem>>, vector<8x8xbf16>,
    %126 = vector.extract_strided_slice %113 {offsets = [3, 0, 0], sizes = [1, 8, 8], strides = [1, 1, 1]} : vector<4x8x8xf32> to vector<1x8x8xf32>
    %127 = vector.shape_cast %126 : vector<1x8x8xf32> to vector<8x8xf32>
    %128 = arith.truncf %127 : vector<8x8xf32> to vector<8x8xbf16>
    %c0_41 = arith.constant 0 : index
    %c24 = arith.constant 24 : index
    %129 = vector.load %arg14[%c0_41, %c24] : memref<8x32xbf16, #tpu.memory_space<vmem>>, vector<8x8xbf16>
    tpu.vector_store %arg14[%c0_41, %c24], %128 {strides = array<i32>} : memref<8x32xbf16, #tpu.memory_space<vmem>>, vector<8x8xbf16>,
    %c0_42 = arith.constant 0 : index
    %c0_43 = arith.constant 0 : index
    %130 = vector.load %arg14[%c0_42, %c0_43] : memref<8x32xbf16, #tpu.memory_space<vmem>>, vector<8x32xbf16>
    %c0_44 = arith.constant 0 : index
    %c0_45 = arith.constant 0 : index
    %131 = vector.load %arg12[%c0_44, %c0_45] : memref<32x32xbf16, #tpu.memory_space<vmem>>, vector<32x32xbf16>
    %cst_46 = arith.constant dense<0.000000e+00> : vector<8x32xf32>
    %132 = tpu.matmul %130, %131, %cst_46 {dimension_numbers = #tpu.dot_dimension_numbers<[1], [0], [0], [1], [0, 0, 1, 1], [], []>} : vector<8x32xbf16>, vector<32x32xbf16>, vector<8x32xf32> -> vector<8x32xf32>
    %133 = arith.addf %1, %132 : vector<8x32xf32>
    %c0_47 = arith.constant 0 : index
    %c0_48 = arith.constant 0 : index
    %c0_49 = arith.constant 0 : index
    %134 = vector.load %arg13[%c0_47, %c0_48, %c0_49] : memref<1x8x32xf32, #tpu.memory_space<vmem>>, vector<1x8x32xf32>
    %135 = vector.shape_cast %134 : vector<1x8x32xf32> to vector<8x32xf32>
    %136 = vector.shape_cast %133 : vector<8x32xf32> to vector<1x8x32xf32>
    tpu.vector_store %arg13[%c0_47, %c0_48, %c0_49], %136 {strides = array<i32>} : memref<1x8x32xf32, #tpu.memory_space<vmem>>, vector<1x8x32xf32>,
    return
  }
  func.func @transform_0(%arg0: i32, %arg1: i32) -> (i32, i32, i32) {
    %c0_i32 = arith.constant 0 : i32
    %c0_i32_0 = arith.constant 0 : i32
    return %arg0, %arg1, %c0_i32 : i32, i32, i32
  }
  func.func @transform_1(%arg0: i32, %arg1: i32) -> (i32, i32, i32) {
    %c0_i32 = arith.constant 0 : i32
    %c0_i32_0 = arith.constant 0 : i32
    %c0_i32_1 = arith.constant 0 : i32
    return %arg0, %c0_i32, %c0_i32_0 : i32, i32, i32
  }
  func.func @transform_2(%arg0: i32, %arg1: i32) -> (i32, i32, i32, i32) {
    %c0_i32 = arith.constant 0 : i32
    %c0_i32_0 = arith.constant 0 : i32
    %c0_i32_1 = arith.constant 0 : i32
    %c0_i32_2 = arith.constant 0 : i32
    return %c0_i32, %c0_i32_0, %arg1, %c0_i32_1 : i32, i32, i32, i32
  }
  func.func @transform_3(%arg0: i32, %arg1: i32) -> (i32, i32) {
    %c0_i32 = arith.constant 0 : i32
    %c0_i32_0 = arith.constant 0 : i32
    %c0_i32_1 = arith.constant 0 : i32
    return %c0_i32, %c0_i32_0 : i32, i32
  }
  func.func @transform_4(%arg0: i32, %arg1: i32) -> (i32, i32) {
    %c0_i32 = arith.constant 0 : i32
    %c0_i32_0 = arith.constant 0 : i32
    %c0_i32_1 = arith.constant 0 : i32
    return %c0_i32, %c0_i32_0 : i32, i32
  }
  func.func @transform_5(%arg0: i32, %arg1: i32) -> (i32, i32) {
    %c0_i32 = arith.constant 0 : i32
    %c0_i32_0 = arith.constant 0 : i32
    %c0_i32_1 = arith.constant 0 : i32
    return %c0_i32, %c0_i32_0 : i32, i32
  }
  func.func @transform_6(%arg0: i32, %arg1: i32) -> (i32, i32) {
    %c0_i32 = arith.constant 0 : i32
    %c0_i32_0 = arith.constant 0 : i32
    %c0_i32_1 = arith.constant 0 : i32
    return %c0_i32, %c0_i32_0 : i32, i32
  }
  func.func @transform_7(%arg0: i32, %arg1: i32) -> (i32, i32) {
    %c0_i32 = arith.constant 0 : i32
    %c0_i32_0 = arith.constant 0 : i32
    %c0_i32_1 = arith.constant 0 : i32
    return %c0_i32, %c0_i32_0 : i32, i32
  }
  func.func @transform_8(%arg0: i32, %arg1: i32) -> (i32, i32) {
    %c0_i32 = arith.constant 0 : i32
    %c0_i32_0 = arith.constant 0 : i32
    %c0_i32_1 = arith.constant 0 : i32
    return %c0_i32, %c0_i32_0 : i32, i32
  }
  func.func @transform_9(%arg0: i32, %arg1: i32) -> (i32, i32) {
    %c0_i32 = arith.constant 0 : i32
    %c0_i32_0 = arith.constant 0 : i32
    %c0_i32_1 = arith.constant 0 : i32
    return %c0_i32, %c0_i32_0 : i32, i32
  }
  func.func @transform_10(%arg0: i32, %arg1: i32) -> (i32, i32) {
    %c0_i32 = arith.constant 0 : i32
    %c0_i32_0 = arith.constant 0 : i32
    %c0_i32_1 = arith.constant 0 : i32
    return %c0_i32, %c0_i32_0 : i32, i32
  }
  func.func @transform_11(%arg0: i32, %arg1: i32) -> (i32, i32, i32) {
    %c0_i32 = arith.constant 0 : i32
    %c0_i32_0 = arith.constant 0 : i32
    return %arg0, %arg1, %c0_i32 : i32, i32, i32
  }
}

</mosaic_0001>

<bundles_post_ra>
// kernel: tpu_custom_call.1
= control target key start
LH: loop header
LB: loop body
LE: loop exit
PB: predicated region body
PF: predicated region fallthrough
CT: control target
= control target key end

     0   :  { %s2276_s0 = inlined_call_operand.vmem [shape: f32[2,8,32], index: 0, kind: input, shape index: {}]   ;;  %s2277_s1 = inlined_call_operand.hbm [shape: f32[2,8,32], index: 1, kind: input, shape index: {}]   ;;  %s2278_s2 = inlined_call_operand.hbm [shape: f32[1,4,8,8], index: 2, kind: input, shape index: {}]   ;;  %s2279_s3 = inlined_call_operand.hbm [shape: f32[1,32], index: 3, kind: input, shape index: {}]   ;;  %s2280_s4 = inlined_call_operand.hbm [shape: bf16[32,32], index: 4, kind: input, shape index: {}]   ;;  %s2281_s5 = inlined_call_operand.hbm [shape: bf16[32,32], index: 5, kind: input, shape index: {}]   ;;  %s2282_s6 = inlined_call_operand.hbm [shape: bf16[32,32], index: 6, kind: input, shape index: {}]   ;;  %s2283_s7 = inlined_call_operand.vmem [shape: bf16[32,16], index: 7, kind: input, shape index: {}]   ;;  %s2284_s8 = inlined_call_operand.hbm [shape: f32[1,16], index: 8, kind: input, shape index: {}]   ;;  %s2285_s9 = inlined_call_operand.hbm [shape: bf16[4,8], index: 9, kind: input, shape index: {}]   ;;  %s2286_s10 = inlined_call_operand.vmem [shape: bf16[32,32], index: 10, kind: input, shape index: {}]   ;;  %s2287_s11 = inlined_call_operand.hbm [shape: f32[2,8,32], index: 11, kind: output, shape index: {}]  }
   0x1   :  { %2292 = sst [smem:[#allocation24_spill]] %s2276_s0 }
   0x2   :  { %2293 = sst [smem:[#allocation25_spill]] %s2278_s2 }
   0x3   :  { %2294 = sst [smem:[#allocation26_spill]] %s2280_s4 }
   0x4   :  { %2295 = sst [smem:[#allocation27_spill]] %s2283_s7 }
   0x5   :  { %2296 = sst [smem:[#allocation28_spill]] %s2286_s10 }
   0x6   :  { %2297 = sst [smem:[#allocation29_spill]] %s2287_s11 }
   0x7   :  { %16 = vsyncpa [#allocation4], 0 }
   0x8   :  { %18 = vsyncpa [#allocation4 + $0x1], 0 }
   0x9   :  { %19 = vsyncpa [#allocation7], 0 }
   0xa   :  { %20 = vsyncpa [#allocation10], 0 }
   0xb   :  { %21 = vsyncpa [#allocation13], 0 }
   0xc   :  { %22 = vsyncpa [#allocation16], 0 }
   0xd   :  { %23 = vsyncpa [#allocation5], 0 }
   0xe   :  { %25 = vsyncpa [#allocation5 + $0x1], 0  ;;  %s1985_s17 = smov 0   ;;  %s1987_s18 = smov 0  }
   0xf   :  { %s1989_s19 = smov 0   ;;  %s1991_s20 = smov 0  }
  0x10   :  { %s1993_s21 = smov 0   ;;  %s1995_s22 = smov 0  }
  0x11 LB: > { %s2288_s23 = sadd.s32 4294967295, %s1903_s22   ;;  %p1290_p0 = scmp.ge.s32.totalorder %s1903_s22, 1  ;;  %s1903_s22 = sphi %s1995_s22, %s31_s22   ;;  %s1899_s21 = sphi %s1993_s21, %s2316_s21   ;;  %s1895_s20 = sphi %s1991_s20, %s2315_s20   ;;  %s1891_s19 = sphi %s1989_s19, %s2314_s19   ;;  %s1887_s18 = sphi %s1987_s18, %s2313_s18   ;;  %s1883_s17 = sphi %s1985_s17, %s2312_s17  }
  0x12   : > { %p2019_p1 = scmp.eq.s32.totalorder %s2288_s23, 0  ;;  %p324_p2 = scmp.lt.s32.totalorder %s1903_s22, 3 }
  0x13   : > { %s2299_s2 = sld [smem:[#allocation25_spill]]  ;;  %s1905_s29 = smov [#allocation6]  }
  0x14   : > { %p2027_p3 = pnand %p1290_p0, %p324_p2  ;;  %s339_s30 = sshll.u32 %s1905_s29, 4  ;;  %s340_s30 = int_to_ptr.vmem [resolvable:$true] %s339_s30 }
  0x15   : > { %p1298_p6 = scmp.ge.s32.totalorder %s1903_s22, 2  ;;  %s2302_s4 = sld [smem:[#allocation26_spill]] }
  0x16   : > { %p1413_p4 = pneg %p2027_p3  ;;  %s1906_s16 = smov 128  }
  0x17   : > { %s1907_s25 = smov 8   ;;  %s1908_s26 = smov [#allocation9]  }
  0x18   : > { %p2035_p5 = pnand %p1413_p4, %p2019_p1  ;;  %s365_s29 = sshll.u32 %s1908_s26, 4  ;;  %s366_s29 = int_to_ptr.vmem [resolvable:$true] %s365_s29 }
  0x19   : > { %s337_s27 = sshll.u32 %s2299_s2, 4  ;;  %s1909_s23 = smov 64   ;;  %s338_s27 = int_to_ptr.hbm [resolvable:$true] %s337_s27 }
  0x1a   : > { %1416 = dma.hbm_to_vmem [thread:$0]  (!%p2035_p5), %s338_s27, 512, %s340_s30, [#allocation7], %s1906_s16, %s1906_s16, %s1907_s25  }
  0x1b   : > { %s363_s15 = sshll.u32 %s2302_s4, 4  ;;  %s1910_s2 = smov 4   ;;  %s364_s15 = int_to_ptr.hbm [resolvable:$true] %s363_s15 }
  0x1c   : > { %1422 = dma.hbm_to_vmem [thread:$0]  (!%p2035_p5), %s364_s15, 256, %s366_s29, [#allocation10], %s1909_s23, %s1909_s23, %s1910_s2  }
  0x1d   : > { %s391_s7 = sshll.u32 %s2282_s6, 4  ;;  %s1911_s13 = smov [#allocation12]   ;;  %s392_s7 = int_to_ptr.hbm [resolvable:$true] %s391_s7 }
  0x1e   : > { %s393_s14 = sshll.u32 %s1911_s13, 4  ;;  %s352_s27 = sshll.u32 %s2279_s3, 4  ;;  %s394_s14 = int_to_ptr.vmem [resolvable:$true] %s393_s14  ;;  %s353_s27 = int_to_ptr.hbm [resolvable:$true] %s352_s27 }
  0x1f   : > { %1428 = dma.hbm_to_vmem [thread:$0]  (!%p2035_p5), %s392_s7, 256, %s394_s14, [#allocation13], %s1909_s23, %s1909_s23, %s1910_s2  }
  0x20   : > { %s1912_s30 = smov [#allocation8]   ;;  %s377_s10 = sshll.u32 %s2281_s5, 4  ;;  %s378_s10 = int_to_ptr.hbm [resolvable:$true] %s377_s10 }
  0x21   : > { %s354_s16 = sshll.u32 %s1912_s30, 4  ;;  %s409_s0 = sshll.u32 %s2284_s8, 4  ;;  %s355_s16 = int_to_ptr.vmem [resolvable:$true] %s354_s16  ;;  %s410_s0 = int_to_ptr.hbm [resolvable:$true] %s409_s0 }
  0x22   : > { %1419 = dma.hbm_to_vmem [thread:$0]  (!%p2035_p5), %s353_s27, 16, %s355_s16, [#allocation7]  }
  0x23   : > { %s1913_s4 = smov [#allocation11]   ;;  %s1914_s29 = smov [#allocation14]  }
  0x24   : > { %s379_s7 = sshll.u32 %s1913_s4, 4  ;;  %s411_s13 = sshll.u32 %s1914_s29, 4  ;;  %s380_s7 = int_to_ptr.vmem [resolvable:$true] %s379_s7  ;;  %s412_s13 = int_to_ptr.vmem [resolvable:$true] %s411_s13 }
  0x25   : > { %1425 = dma.hbm_to_vmem [thread:$0]  (!%p2035_p5), %s378_s10, 256, %s380_s7, [#allocation10], %s1909_s23, %s1909_s23, %s1910_s2  }
  0x26   : > { %s421_s30 = sshll.u32 %s2285_s9, 4  ;;  %s1915_s16 = smov [#allocation15]   ;;  %s422_s30 = int_to_ptr.hbm [resolvable:$true] %s421_s30 }
  0x27   : > { %1431 = dma.hbm_to_vmem [thread:$0]  (!%p2035_p5), %s410_s0, 16, %s412_s13, [#allocation13]  }
  0x28   : > { %s423_s25 = sshll.u32 %s1915_s16, 4  ;;  %s1289_s2 = sadd.s32 4294967294, %s1903_s22   ;;  %s424_s25 = int_to_ptr.vmem [resolvable:$true] %s423_s25 }
  0x29   : > { %1434 = dma.hbm_to_vmem [thread:$0]  (!%p2035_p5), %s422_s30, 32, %s424_s25, [#allocation16]  }
  0x2a   : > { %s43_s23 = sadd.s32 1, %s1899_s21  ;;  %s78_s15 = sadd.s32 1, %s1891_s19 }
  0x2b   : > { %p45_p7 = scmp.ge.s32.totalorder %s43_s23, 2  ;;  %p85_p8 = scmp.ne.s32.totalorder %s1891_s19, %s1887_s18 }
  0x2c   : > { %p86_p9 = scmp.eq.s32.totalorder %s1903_s22, 0  ;;  %p91_p10 = scmp.ne.s32.totalorder %s1887_s18, %s1883_s17 }
  0x2d   : > { %s2318_s23 = smov (%p45_p7, %s43_s23), 0  ;;  %s2305_s26 = sadd.s32 4294967295, %s1903_s22  }
  0x2e   : > { %p2082_p11 = por %p86_p9, %p85_p8  ;;  %p2088_p12 = por %p2019_p1, %p91_p10 }
  0x2f   : > { %s75_s11 = ssub.s32 %s1899_s21, %s2318_s23  ;;  %p311_p13 = scmp.eq.s32.totalorder %s2305_s26, 1 }
  0x30   : > { %p76_p0 = scmp.eq.s32.totalorder %s75_s11, 0  ;;  %p317_p2 = scmp.eq.s32.totalorder %s1289_s2, 1 }
  0x31   : > { %p2096_p4 = por %p311_p13, %p85_p8  ;;  %p1450_p5 = scmp.lt.s32.totalorder %s1903_s22, 2 }
  0x32   : > { %s2102_s4 = scalar_select %p76_p0, %s1891_s19, %s78_s15  }
  0x33   : > { %p2104_p7 = por %p317_p2, %p91_p10  ;;  %s447_s29 = sand.u32 1, %s1891_s19  }
  0x34   : > { %s1299_s13 = sshll.u32 %s447_s29, 3  ;;  %s1300_s14 = sshll.u32 %s1899_s21, 3 }
  0x35   : > { %s455_s16 = scalar_lea.hbm %s2277_s1, %s1300_s14  ;;  %s451_s25 = scalar_lea.vmem [#allocation3], %s1299_s13 }
  0x36   : > { %s459_s2 = sshll.u32 %s451_s25, 4  ;;  %s457_s11 = sshll.u32 %s455_s16, 4  ;;  %s460_s2 = int_to_ptr.vmem [resolvable:$true] %s459_s2  ;;  %s458_s11 = int_to_ptr.hbm [resolvable:$true] %s457_s11 }
  0x37   : > { %p1436_p8 = pnand %p1450_p5, %p2082_p11  ;;  %s448_s15 = scalar_lea.sflag [#allocation4], %s447_s29 }
  0x38   : > { %468 = sbr.rel (%p2027_p3) target bundleno = 1259 (0x4eb), region = 64  ;;  %s2118_s26 = sand.u32 (!%p2027_p3), 1, %s1887_s18  }
  0x39   : > { %1438 = dma.hbm_to_vmem [thread:$0]  (!%p1436_p8), %s458_s11, 128, %s460_s2, %s448_s15  }
  0x3a   : > { %s1302_s14 = sshll.u32 (!%p2027_p3), %s2118_s26, 3  ;;  %s471_s13 = scalar_lea.sflag (!%p2027_p3), [#allocation4], %s2118_s26 }
  0x3b   : > { %s474_s27 = scalar_lea.vmem (!%p2027_p3), [#allocation3], %s1302_s14 }
  0x3d   : > { %1858 = dma.done.wait (%p2088_p12), %s471_s13, 128  }
  0x3e   : > { %1860 = vsyncadd (%p2088_p12), %s471_s13, 4294967168 }
  0x3f   : > { %1862 = dma.done.wait (%p2019_p1), [#allocation7], 528  }
  0x40   : > { %1864 = vsyncadd (%p2019_p1), [#allocation7], 4294966768 }
  0x41   : > { %1866 = dma.done.wait (%p2019_p1), [#allocation10], 512  }
  0x42   : > { %1868 = vsyncadd (%p2019_p1), [#allocation10], 4294966784 }
  0x43   : > { %1870 = dma.done.wait (%p2019_p1), [#allocation13], 272  }
  0x44   : > { %1872 = vsyncadd (%p2019_p1), [#allocation13], 4294967024 }
  0x45   : > { %1874 = dma.done.wait (%p2019_p1), [#allocation16], 32  }
  0x46   : > { %1876 = vsyncadd (%p2019_p1), [#allocation16], 4294967264  ;;  %p556_p3 = scmp.lt.s32.totalorder %s1895_s20, 1  ;;  %s2308_s30 = sld [smem:[#allocation24_spill]]  ;;  %vm567_vm0 = vcmask 261120   ;;  %v1374_v1 = vld [vmem:[#allocation11 + $0x8] sm:$0xff] }
  0x47   : > { %655 = vmatpush.bf16.msra.mxu1 %v1374_v1  ;;  %v1373_v3 = vld [vmem:[#allocation11] sm:$0xff]  ;;  %v1916_v7 = vmov 32.0   ;;  %v1372_v11 = vld [vmem:[#allocation9 + $0x8] sm:$0xff]  ;;  %s2309_s2 = sld [smem:[#allocation27_spill]]  ;;  %v1371_v14 = vld [vmem:[#allocation9] sm:$0xff]  ;;  %vm762_vm5 = vcmask 64512  }
  0x48   : > { %s557_s28 = scalar_select %p556_p3, %s1895_s20, 1  ;;  %v565_v5 = vld [vmem:[%s474_s27] sm:$0xff]  ;;  %1529 = vrcp.f32 %v1916_v7  ;;  %623 = vmatpush.bf16.msra.mxu2 %v1372_v11  ;;  %v1527_v27 = vld [vmem:[#allocation8] ss:$0 sm:$0xff]  ;;  %v1375_v44 = vld [vmem:[#allocation12] sm:$0xff]  ;;  %vm964_vm6 = vcmask 31744  }
  0x49   : > { %v2154_v6 = vpack.c.bf16 %v565_v5, %v565_v5  ;;  %s1917_s13 = smov 104   ;;  %s1918_s27 = smov 112   ;;  %v1528_v41 = vld [vmem:[#allocation14] ss:$0 sm:$0xff]  ;;  %v1376_v43 = vld [vmem:[#allocation12 + $0x8] sm:$0xff]  ;;  %v758_v59 = vld [vmem:[#allocation6] sm:$0xff] }
  0x4a   : > { %s1311_s10 = sshll.u32 %s557_s28, 3  ;;  %s1919_s28 = smov 120   ;;  %vm890_vm7 = vcmask 1043456   ;;  %vm1018_vm8 = vcmask 1041408   ;;  %vm1050_vm9 = vcmask 60416   ;;  %vm1057_vm10 = vcmask 126016  }
  0x4b   : > { %656 = vmatpush.bf16.msra.mxu1 %v1373_v3  ;;  %s1921_s12 = smov 116   ;;  %s1922_s29 = smov 24   ;;  %vm1064_vm11 = vcmask 191616   ;;  %vm1071_vm12 = vcmask 257216  }
  0x4c   : > { %s562_s16 = scalar_lea.vmem %s2308_s30, %s1311_s10  ;;  %624 = vmatpush.bf16.msra.mxu2 %v1371_v14  ;;  %s1920_s10 = smov 124  }
  0x4d   : > { %v2149_v0 = vld [vmem:[%s562_s16] sm:$0xff]  ;;  %v1378_v12 = vld [vmem:[%s2309_s2 + $0x8] sm:$0xff]  ;;  %s1923_s30 = smov 16   ;;  %s1924_s16 = smov 8  }
  0x4e   : > { %v566_v2 = vmul.f32 %v2149_v0, %v2149_v0  ;;  %1329 = vmatmul.msk.bf16.vlgmr.msra.gmra.mxu1 %vm567_vm0, %v2154_v6  ;;  %v1530_v8 = vpop.eup %1529  ;;  %717 = vmatpush.bf16.msra.mxu3 %v1378_v12  ;;  %v1377_v15 = vld [vmem:[%s2309_s2] sm:$0xff]  ;;  %s2310_s11 = sld [smem:[#allocation28_spill]]  ;;  %s1109_s25 = scalar_lea.sflag [#allocation5], %s2118_s26 }
  0x4f   : > { %v572_v9 = vmul.f32 32.0, %v1530_v8  ;;  %vm576_vm1 = vweird.f32 %v1530_v8 }
  0x50   : > { %v568_v4 = vsel %vm567_vm0, %v566_v2, 0.0  ;;  %684 = vmatpush.bf16.msrb.mxu2 %v1376_v43 }
  0x51   : > { %569 = vadd.xlane.f32.xlu0 %v568_v4  ;;  %v573_v10 = vsub.f32 1.0, %v572_v9 }
  0x52   : > { %718 = vmatpush.bf16.msra.mxu3 %v1377_v15 }
  0x53   : > { %v574_v13 = vmul.f32 %v1530_v8, %v573_v10  ;;  %v761_v10 = vld [vmem:[#allocation6 + $0x18] sm:$0xff] }
  0x54   : > { %685 = vmatpush.bf16.msrb.mxu2 %v1375_v44 }
  0x55   : > { %v575_v16 = vadd.f32 %v1530_v8, %v574_v13 }
  0x57   : > { %v577_v17 = vsel %vm576_vm1, %v1530_v8, %v575_v16 }
  0xc4   : > { %v570_v18 = vpop.xlane.xlu0 %569 }
  0xc5   : > { %v578_v19 = vmul.f32 %v577_v17, %v570_v18 }
  0xc7   : > { %v579_v20 = vadd.f32 1e-06, %v578_v19 }
  0xc9   : > { %1531 = vrsqrt.f32 %v579_v20  ;;  %vm586_vm3 = vweird.f32 %v579_v20 }
  0xcb   : > { %v658_v32 = vpop.f32.mrf.mxu1 }
  0xcc   : > { %v732_v33 = vpack.c.bf16 %v658_v32, %v658_v32 }
  0xce   : > { %738 = vrot.lane.b32.xlu1 %v732_v33, %s1917_s13  ;;  %736 = vrot.lane.b32.xlu0 %v732_v33, %s1918_s27  ;;  %v767_v34 = vsel %vm762_vm5, %v732_v33, 0 }
  0xcf   : > { %v1532_v21 = vpop.eup %1531  ;;  %776 = vmatpush.bf16.xpose.msra.mxu0 %v767_v34 }
  0xd0   : > { %v581_v22 = vmul.f32 %v1532_v21, %v579_v20  ;;  %vm587_vm2 = vweird.f32 %v1532_v21 }
  0xd1   : > { %vm588_vm4 = vmor %vm586_vm3, %vm587_vm2 }
  0xd2   : > { %v582_v23 = vmul.f32 %v1532_v21, %v581_v22 }
  0xd3   : > { %v660_v35 = vpop.f32.mrf.mxu1 }
  0xd4   : > { %v583_v24 = vmul.f32 0.5, %v582_v23 }
  0xd6   : > { %v584_v25 = vsub.f32 1.5, %v583_v24  ;;  %v760_v24 = vld [vmem:[#allocation6 + $0x10] sm:$0xff] }
  0xd8   : > { %v585_v26 = vmul.f32 %v1532_v21, %v584_v25 }
  0xda   : > { %v589_v28 = vsel %vm588_vm4, %v1532_v21, %v585_v26 }
  0xdb   : > { %v590_v29 = vmul.f32 %v589_v28, %v2149_v0  ;;  %v759_v28 = vld [vmem:[#allocation6 + $0x8] sm:$0xff] }
  0xdd   : > { %v595_v30 = vmul.f32 %v1527_v27, %v590_v29 }
  0xdf   : > { %v596_v31 = vpack.c.bf16 %v595_v30, %v595_v30 }
  0xe1   : > { %1320 = vmatmul.msk.bf16.vlgmr.msra.gmra.mxu2 %vm567_vm0, %v596_v31  ;;  %1347 = vmatmul.msk.bf16.vlgmr.msra.gmra.mxu3 %vm567_vm0, %v596_v31 }
  0xf1   : > { %1338 = vmatmul.msk.bf16.vlgmr.msrb.gmra.mxu2 %vm567_vm0, %v2154_v6 }
 0x140   : > { %v739_v45 = vpop.permute.xlu1 %738  ;;  %v737_v48 = vpop.permute.xlu0 %736 }
 0x141   : > { %v824_v46 = vsel %vm762_vm5, %v739_v45, 0  ;;  %v805_v49 = vsel %vm762_vm5, %v737_v48, 0 }
 0x142   : > { %833 = vmatpush.bf16.xpose.msrb.mxu3 %v824_v46  ;;  %814 = vmatpush.bf16.xpose.msra.mxu2 %v805_v49 }
 0x164   : > { %v626_v36 = vpop.f32.mrf.mxu2  ;;  %v720_v37 = vpop.f32.mrf.mxu3 }
 0x165   : > { %v724_v38 = vpack.c.bf16 %v626_v36, %v626_v36  ;;  %v721_v42 = vadd.f32 %v1528_v41, %v720_v37 }
 0x167   : > { %730 = vrot.lane.b32.xlu2 %v724_v38, %s1917_s13  ;;  %728 = vrot.lane.b32.xlu1 %v724_v38, %s1918_s27  ;;  %v965_v47 = vsel %vm964_vm6, %v721_v42, -inf }
 0x168   : > { %1348 = vmatmul.msk.bf16.vlgmr.msra.gmra.mxu0 %vm762_vm5, %v724_v38 }
 0x16c   : > { %v628_v39 = vpop.f32.mrf.mxu2  ;;  %v722_v40 = vpop.f32.mrf.mxu3 }
 0x16f   : > { %734 = vrot.lane.b32.xlu2 %v732_v33, %s1919_s28  ;;  %726 = vrot.lane.b32.xlu1 %v724_v38, %s1919_s28 }
 0x174   : > { %v687_v3 = vpop.f32.mrf.mxu2 }
 0x175   : > { %v2189_v5 = vpack.c.bf16 %v687_v3, %v687_v3 }
 0x177   : > { %749 = vrot.lane.b32.xlu2 %v721_v42, %s1920_s10  ;;  %752 = vrot.lane.b32.xlu1 %v721_v42, %s1919_s28  ;;  %v892_v6 = vsel %vm890_vm7, %v2189_v5, 0 }
 0x178   : > { %901 = vmatpush.bf16.msrb.mxu0 %v892_v6 }
 0x17c   : > { %v689_v4 = vpop.f32.mrf.mxu2 }
 0x17f   : > { %755 = vrot.lane.b32.xlu2 %v721_v42, %s1921_s12  ;;  %s2311_s12 = sld [smem:[#allocation29_spill]] }
 0x1a1   : > { %966 = vmax.xlane.f32.xlu1 %v965_v47 }
 0x1c1   : > { %v731_v50 = vpop.permute.xlu2 %730 }
 0x1c2   : > { %1351 = vmatmul.msk.bf16.vlgmr.msrb.gmra.mxu3 %vm762_vm5, %v731_v50 }
 0x1c9   : > { %v735_v51 = vpop.permute.xlu2 %734 }
 0x1ca   : > { %v786_v52 = vsel %vm762_vm5, %v735_v51, 0 }
 0x1cb   : > { %795 = vmatpush.bf16.xpose.msrb.mxu1 %v786_v52 }
 0x1d1   : > { %v750_v53 = vpop.permute.xlu2 %749 }
 0x1d2   : > { %v968_v54 = vsel %vm964_vm6, %v750_v53, -inf }
 0x1d3   : > { %969 = vmax.xlane.f32.xlu2 %v968_v54 }
 0x1d9   : > { %v756_v55 = vpop.permute.xlu2 %755  ;;  %v729_v56 = vpop.permute.xlu1 %728 }
 0x1da   : > { %1350 = vmatmul.msk.bf16.vlgmr.msra.gmra.mxu2 %vm762_vm5, %v729_v56  ;;  %v974_v57 = vsel %vm964_vm6, %v756_v55, -inf }
 0x1db   : > { %975 = vmax.xlane.f32.xlu2 %v974_v57 }
 0x1e1   : > { %v727_v58 = vpop.permute.xlu1 %726 }
 0x1e2   : > { %1349 = vmatmul.msk.bf16.vlgmr.msrb.gmra.mxu1 %vm762_vm5, %v727_v58  ;;  %v1011_v58 = vld [vmem:[#allocation15] sm:$0x3] }
 0x1e5   : > { %v778_v60 = vpop.f32.mrf.mxu0 }
 0x1e6   : > { %v779_v61 = vadd.f32 %v778_v60, %v758_v59  ;;  %v1020_v59 = vsel %vm1018_vm8, %v1011_v58, 0 }
 0x1e7   : > { %1029 = vmatpush.bf16.msra.mxu0 %v1020_v59 }
 0x1e8   : > { %v839_v62 = vsel %vm762_vm5, %v779_v61, -inf }
 0x1e9   : > { %840 = vmax.xlane.f32.xlu0 %v839_v62  ;;  %v753_v63 = vpop.permute.xlu1 %752 }
 0x1ea   : > { %v971_v2 = vsel %vm964_vm6, %v753_v63, -inf }
 0x1ed   : > { %v780_v1 = vpop.f32.mrf.mxu0 }
 0x1f1   : > { %972 = vmax.xlane.f32.xlu0 %v971_v2 }
 0x214   : > { %v967_v7 = vpop.xlane.xlu1 %966 }
 0x215   : > { %v977_v8 = vsub.f32 %v721_v42, %v967_v7 }
 0x217   : > { %v981_v9 = vmul.f32 1.442695, %v977_v8 }
 0x219   : > { %1533 = vpow2.f32 %v981_v9 }
 0x21f   : > { %v2194_v15 = vpop.eup %1533 }
 0x220   : > { %v989_v19 = vsel %vm964_vm6, %v2194_v15, 0.0 }
 0x245   : > { %v835_v11 = vpop.f32.mrf.mxu3 }
 0x246   : > { %v836_v12 = vadd.f32 %v835_v11, %v761_v10  ;;  %v970_v13 = vpop.xlane.xlu2 %969 }
 0x247   : > { %v978_v22 = vsub.f32 %v750_v53, %v970_v13 }
 0x248   : > { %v848_v14 = vsel %vm762_vm5, %v836_v12, -inf }
 0x249   : > { %849 = vmax.xlane.f32.xlu0 %v848_v14  ;;  %v983_v26 = vmul.f32 1.442695, %v978_v22 }
 0x24d   : > { %v837_v16 = vpop.f32.mrf.mxu3 }
 0x24e   : > { %v976_v17 = vpop.xlane.xlu2 %975 }
 0x24f   : > { %v980_v18 = vsub.f32 %v756_v55, %v976_v17 }
 0x251   : > { %v987_v20 = vmul.f32 1.442695, %v980_v18  ;;  %990 = vadd.xlane.f32.xlu0 %v989_v19 }
 0x253   : > { %1535 = vpow2.f32 %v987_v20 }
 0x254   : > { %1537 = vpow2.f32 %v983_v26 }
 0x259   : > { %v2198_v21 = vpop.eup %1535 }
 0x25a   : > { %v998_v23 = vsel %vm964_vm6, %v2198_v21, 0.0  ;;  %v1538_v37 = vpop.eup %1537 }
 0x25b   : > { %999 = vadd.xlane.f32.xlu0 %v998_v23  ;;  %v992_v41 = vsel %vm964_vm6, %v1538_v37, 0.0 }
 0x25c   : > { %v841_v25 = vpop.xlane.xlu0 %840 }
 0x25d   : > { %v816_v27 = vpop.f32.mrf.mxu2  ;;  %v851_v38 = vsub.f32 %v779_v61, %v841_v25 }
 0x25e   : > { %v817_v29 = vadd.f32 %v816_v27, %v760_v24 }
 0x25f   : > { %v797_v30 = vpop.f32.mrf.mxu1  ;;  %v855_v42 = vmul.f32 1.442695, %v851_v38 }
 0x260   : > { %v798_v31 = vadd.f32 %v797_v30, %v759_v28  ;;  %v845_v32 = vsel %vm762_vm5, %v817_v29, -inf }
 0x261   : > { %846 = vmax.xlane.f32.xlu1 %v845_v32 }
 0x262   : > { %v842_v33 = vsel %vm762_vm5, %v798_v31, -inf }
 0x263   : > { %843 = vmax.xlane.f32.xlu2 %v842_v33 }
 0x264   : > { %v973_v34 = vpop.xlane.xlu0 %972 }
 0x265   : > { %v979_v35 = vsub.f32 %v753_v63, %v973_v34  ;;  %v818_v36 = vpop.f32.mrf.mxu2 }
 0x267   : > { %v985_v39 = vmul.f32 1.442695, %v979_v35  ;;  %v799_v40 = vpop.f32.mrf.mxu1 }
 0x269   : > { %1539 = vpow2.f32 %v985_v39 }
 0x26a   : > { %1541 = vpow2.f32 %v855_v42 }
 0x26b   : > { %993 = vadd.xlane.f32.xlu2 %v992_v41 }
 0x26f   : > { %v1540_v43 = vpop.eup %1539 }
 0x270   : > { %v995_v44 = vsel %vm964_vm6, %v1540_v43, 0.0  ;;  %v1542_v45 = vpop.eup %1541 }
 0x271   : > { %996 = vadd.xlane.f32.xlu1 %v995_v44  ;;  %v863_v46 = vsel %vm762_vm5, %v1542_v45, 0.0 }
 0x279   : > { %864 = vadd.xlane.f32.xlu1 %v863_v46 }
 0x2bc   : > { %v850_v47 = vpop.xlane.xlu0 %849 }
 0x2bd   : > { %v854_v48 = vsub.f32 %v836_v12, %v850_v47 }
 0x2bf   : > { %v861_v49 = vmul.f32 1.442695, %v854_v48 }
 0x2c1   : > { %1543 = vpow2.f32 %v861_v49 }
 0x2c4   : > { %v991_v8 = vpop.xlane.xlu0 %990 }
 0x2c7   : > { %v1544_v50 = vpop.eup %1543 }
 0x2c8   : > { %v872_v51 = vsel %vm762_vm5, %v1544_v50, 0.0 }
 0x2c9   : > { %873 = vadd.xlane.f32.xlu1 %v872_v51 }
 0x2ce   : > { %v1000_v14 = vpop.xlane.xlu0 %999 }
 0x2d4   : > { %v847_v52 = vpop.xlane.xlu1 %846 }
 0x2d5   : > { %v853_v53 = vsub.f32 %v817_v29, %v847_v52 }
 0x2d6   : > { %v844_v54 = vpop.xlane.xlu2 %843 }
 0x2d7   : > { %v859_v55 = vmul.f32 1.442695, %v853_v53  ;;  %v852_v56 = vsub.f32 %v798_v31, %v844_v54 }
 0x2d9   : > { %1545 = vpow2.f32 %v859_v55  ;;  %v857_v57 = vmul.f32 1.442695, %v852_v56 }
 0x2db   : > { %1547 = vpow2.f32 %v857_v57 }
 0x2de   : > { %v994_v6 = vpop.xlane.xlu2 %993 }
 0x2df   : > { %v1546_v60 = vpop.eup %1545 }
 0x2e0   : > { %v869_v61 = vsel %vm762_vm5, %v1546_v60, 0.0 }
 0x2e1   : > { %v1548_v62 = vpop.eup %1547  ;;  %870 = vadd.xlane.f32.xlu2 %v869_v61  ;;  %v1380_v61 = vld [vmem:[%s2310_s11 + $0x8] sm:$0xff] }
 0x2e2   : > { %746 = vrot.lane.b32.xlu1 %v2189_v5, %s1917_s13  ;;  %v866_v63 = vsel %vm762_vm5, %v1548_v62, 0.0 }
 0x2e3   : > { %867 = vadd.xlane.f32.xlu0 %v866_v63 }
 0x2e4   : > { %v997_v1 = vpop.xlane.xlu1 %996 }
 0x2ec   : > { %v865_v2 = vpop.xlane.xlu1 %864 }
 0x2ed   : > { %1549 = vrcp.f32 %v865_v2 }
 0x2ee   : > { %1551 = vrcp.f32 %v994_v6 }
 0x2ef   : > { %1553 = vrcp.f32 %v991_v8 }
 0x2f0   : > { %1555 = vrcp.f32 %v997_v1 }
 0x2f1   : > { %1557 = vrcp.f32 %v1000_v14 }
 0x2f3   : > { %v1550_v3 = vpop.eup %1549 }
 0x2f4   : > { %v879_v4 = vmul.f32 %v1550_v3, %v1542_v45  ;;  %v1552_v9 = vpop.eup %1551 }
 0x2f5   : > { %v1554_v10 = vpop.eup %1553  ;;  %v1006_v11 = vmul.f32 %v1552_v9, %v1538_v37 }
 0x2f6   : > { %v883_v7 = vpack.c.bf16 %v879_v4, %v879_v4  ;;  %v1005_v12 = vmul.f32 %v1554_v10, %v2194_v15  ;;  %v1556_v16 = vpop.eup %1555 }
 0x2f7   : > { %742 = vrot.lane.b32.xlu0 %v2189_v5, %s1919_s28  ;;  %v1558_v17 = vpop.eup %1557  ;;  %v1007_v18 = vmul.f32 %v1556_v16, %v1540_v43 }
 0x2f8   : > { %1352 = vmatmul.msk.bf16.vlgmr.msrb.gmra.mxu0 %vm762_vm5, %v883_v7  ;;  %v1009_v13 = vpack.c.bf16 %v1006_v11, %v1005_v12  ;;  %v1008_v19 = vmul.f32 %v1558_v17, %v2198_v21 }
 0x2f9   : > { %744 = vrot.lane.b32.xlu2 %v2189_v5, %s1918_s27  ;;  %s1368_s27 = sshll.u32 %s1895_s20, 3 }
 0x2fa   : > { %v1010_v20 = vpack.c.bf16 %v1008_v19, %v1007_v18 }
 0x308   : > { %1356 = vmatmul.msk.bf16.vlgmr.msra.gmra.mxu0 %vm964_vm6, %v1009_v13 }
 0x318   : > { %1357 = vmatmul.msk.bf16.gmra.mxu0 %vm964_vm6, %v1010_v20 }
 0x33c   : > { %v874_v5 = vpop.xlane.xlu1 %873 }
 0x33d   : > { %1559 = vrcp.f32 %v874_v5 }
 0x343   : > { %v1560_v22 = vpop.eup %1559 }
 0x344   : > { %v882_v23 = vmul.f32 %v1560_v22, %v1544_v50 }
 0x346   : > { %v886_v26 = vpack.c.bf16 %v882_v23, %v882_v23 }
 0x354   : > { %v871_v24 = vpop.xlane.xlu2 %870  ;;  %v747_v15 = vpop.permute.xlu1 %746 }
 0x355   : > { %1561 = vrcp.f32 %v871_v24  ;;  %v949_v25 = vsel %vm890_vm7, %v747_v15, 0 }
 0x356   : > { %958 = vmatpush.bf16.msra.mxu3 %v949_v25  ;;  %v868_v29 = vpop.xlane.xlu0 %867 }
 0x357   : > { %1563 = vrcp.f32 %v868_v29 }
 0x359   : > { %1355 = vmatmul.msk.bf16.vlgmr.msra.gmra.mxu3 %vm762_vm5, %v886_v26 }
 0x35b   : > { %v1562_v27 = vpop.eup %1561 }
 0x35c   : > { %v881_v28 = vmul.f32 %v1562_v27, %v1546_v60  ;;  %v745_v21 = vpop.permute.xlu2 %744 }
 0x35d   : > { %v930_v30 = vsel %vm890_vm7, %v745_v21, 0  ;;  %v1564_v32 = vpop.eup %1563 }
 0x35e   : > { %v885_v31 = vpack.c.bf16 %v881_v28, %v881_v28  ;;  %939 = vmatpush.bf16.msrb.mxu2 %v930_v30  ;;  %v880_v33 = vmul.f32 %v1564_v32, %v1548_v62  ;;  %v1379_v62 = vld [vmem:[%s2310_s11] sm:$0xff] }
 0x360   : > { %v884_v36 = vpack.c.bf16 %v880_v33, %v880_v33 }
 0x361   : > { %1354 = vmatmul.msk.bf16.vlgmr.msrb.gmra.mxu2 %vm762_vm5, %v885_v31 }
 0x369   : > { %v743_v34 = vpop.permute.xlu0 %742 }
 0x36a   : > { %v911_v35 = vsel %vm890_vm7, %v743_v34, 0 }
 0x36b   : > { %920 = vmatpush.bf16.msra.mxu1 %v911_v35 }
 0x36e   : > { %1353 = vmatmul.msk.bf16.vlgmr.msra.gmra.mxu1 %vm762_vm5, %v884_v36 }
 0x36f   : > { %1099 = vmatpush.bf16.msrb.mxu1 %v1380_v61 }
 0x373   : > { %1100 = vmatpush.bf16.msrb.mxu1 %v1379_v62 }
 0x375   : > { %v903_v37 = vpop.f32.mrf.mxu0 }
 0x37d   : > { %v905_v38 = vpop.f32.mrf.mxu0 }
 0x385   : > { %v1031_v39 = vpop.f32.mrf.mxu0 }
 0x386   : > { %v1041_v40 = vadd.f32 1.0, %v1031_v39 }
 0x388   : > { %v1045_v41 = vmul.f32 %v1041_v40, %v903_v37 }
 0x38a   : > { %v1049_v42 = vpack.c.bf16 %v1045_v41, %v1045_v41 }
 0x38c   : > { %1051 = vst.msk [vmem:[#allocation2] sm:$0xf] %vm1050_vm9, %v1049_v42 }
 0x38d   : > { %v1033_v43 = vpop.f32.mrf.mxu0 }
 0x38e   : > { %v1042_v55 = vadd.f32 1.0, %v1033_v43 }
 0x395   : > { %v1036_v44 = vpop.f32.mrf.mxu0 }
 0x396   : > { %v1043_v50 = vadd.f32 1.0, %v1036_v44 }
 0x39d   : > { %v1038_v45 = vpop.f32.mrf.mxu0 }
 0x39e   : > { %v1044_v46 = vadd.f32 1.0, %v1038_v45 }
 0x3dc   : > { %v960_v47 = vpop.f32.mrf.mxu3 }
 0x3dd   : > { %v1048_v48 = vmul.f32 %v1044_v46, %v960_v47 }
 0x3df   : > { %v1066_v49 = vpack.c.bf16 %v1048_v48, %v1048_v48 }
 0x3e1   : > { %1068 = vrot.lane.b32.xlu1 %v1066_v49, %s1922_s29  ;;  %s1120_s29 = scalar_lea.hbm %s2311_s12, %s1368_s27 }
 0x3e2   : > { %s1124_s24 = sshll.u32 %s1120_s29, 4  ;;  %s1125_s24 = int_to_ptr.hbm [resolvable:$true] %s1124_s24 }
 0x3e3   : > { %s1819_s15 = sshra.s32 %s1125_s24, 4  ;;  %s1820_s15 = int_to_ptr.hbm [resolvable:$true] %s1819_s15 }
 0x3e4   : > { %v941_v51 = vpop.f32.mrf.mxu2  ;;  %v962_v52 = vpop.f32.mrf.mxu3  ;;  %s1821_s13 = scalar_lea.hbm %s1820_s15, 8  ;;  %p1826_p11 = scmp.lt.s32.totalorder %s1820_s15, %s2311_s12 }
 0x3e5   : > { %v1047_v53 = vmul.f32 %v1043_v50, %v941_v51  ;;  %p1822_p1 = scmp.ne.s32.totalorder %s1820_s15, %s1821_s13 }
 0x3e7   : > { %v1059_v54 = vpack.c.bf16 %v1047_v53, %v1047_v53  ;;  %p1823_p9 = pnand %p1822_p1, %p2096_p4 }
 0x3e9   : > { %1061 = vrot.lane.b32.xlu0 %v1059_v54, %s1923_s30  ;;  %s555_s30 = scalar_lea.vmem [#allocation17], %s1302_s14  ;;  %p1824_p10 = pneg %p1823_p9 }
 0x3ea   : > { %s1825_s14 = scalar_lea.hbm %s2311_s12, 16 }
 0x3eb   : > { %v922_v56 = vpop.f32.mrf.mxu1  ;;  %p1827_p12 = scmp.lt.s32.totalorder %s1825_s14, %s1821_s13 }
 0x3ec   : > { %v1046_v57 = vmul.f32 %v1042_v55, %v922_v56  ;;  %v943_v58 = vpop.f32.mrf.mxu2 }
 0x3ed   : > { %p1828_p13 = por %p1827_p12, %p1826_p11 }
 0x3ee   : > { %v1052_v59 = vpack.c.bf16 %v1046_v57, %v1046_v57 }
 0x3ef   : > { %p1829_p0 = pnand %p1828_p13, %p1824_p10 }
 0x3f0   : > { %1054 = vrot.lane.b32.xlu2 %v1052_v59, %s1924_s16  ;;  %s1122_s16 = sshll.u32 %s555_s30, 4  ;;  %s1123_s16 = int_to_ptr.vmem [resolvable:$true] %s1122_s16 }
 0x3f3   : > { %v924_v60 = vpop.f32.mrf.mxu1 }
 0x44a   : > { %v1055_v63 = vpop.permute.xlu2 %1054 }
 0x44b   : > { %1058 = vst.msk [vmem:[#allocation2] sm:$0xf] %vm1057_vm10, %v1055_v63 }
 0x453   : > { %v1069_v2 = vpop.permute.xlu1 %1068 }
 0x45b   : > { %v1062_v1 = vpop.permute.xlu0 %1061 }
 0x45c   : > { %1065 = vst.msk [vmem:[#allocation2] sm:$0xf] %vm1064_vm11, %v1062_v1 }
 0x45d   : > { %1072 = vst.msk [vmem:[#allocation2] sm:$0xf] %vm1071_vm12, %v1069_v2 }
 0x464   : > { %v1073_v3 = vld [vmem:[#allocation2] sm:$0xf] }
 0x465   : > { %1366 = vmatmul.msk.bf16.vlgmr.msrb.gmra.mxu1 %vm567_vm0, %v1073_v3 }
 0x4e2   : > { %v1102_v4 = vpop.f32.mrf.mxu1 }
 0x4e3   : > { %v1106_v6 = vadd.f32 %v1102_v4, %v2149_v0 }
 0x4e5   : > { %1107 = vst.msk [vmem:[%s555_s30] sm:$0xff] %vm567_vm0, %v1106_v6 }
 0x4e6   : > { %1832 = shalt.err (!%p1829_p0)
}
 0x4e7   : > { %1411 = dma.vmem_to_hbm [thread:$0]  (%p2096_p4), %s1123_s16, 128, %s1125_s24, %s1109_s25  }
 0x4ea   : > { %v1104_v0 = vpop.f32.mrf.mxu1 }
 0x4eb PF: > { %s1136_s26 = sand.u32 1, %s1883_s17   ;;  %p1440_p2 = pnand %p1298_p6, %p2104_p7 }
 0x4ec   : > { %s1137_s29 = scalar_lea.sflag [#allocation5], %s1136_s26 }
 0x4ed   : > { %p1441_p5 = pneg %p1440_p2 }
 0x4ef   : > { %1878 = dma.done.wait (%p1441_p5), %s1137_s29, 128  }
 0x4f0   : > { %1880 = vsyncadd (%p1441_p5), %s1137_s29, 4294967168  ;;  %s31_s22 = sadd.s32 1, %s1903_s22   ;;  %s2312_s17 = smov %s1887_s18 }
 0x4f1   : > { %p28_p8 = scmp.ge.s32.totalorder %s31_s22, 4   ;;  %s2313_s18 = smov %s1891_s19 }
 0x4f2   : > { %s2314_s19 = smov %s2102_s4  ;;  %s2315_s20 = smov %s1899_s21 }
 0x4f3   : > { %s2316_s21 = smov %s2318_s23  ;;  %30 = sbr.rel (!%p28_p8) target bundleno = 17 (0x11), region = 141 }
 0x4f8   :  { %1143 = vsyncpa [#allocation4], 1 }
 0x4f9   :  { %1145 = vsyncpa [#allocation4 + $0x1], 1 }
 0x4fa   :  { %1146 = vsyncpa [#allocation7], 1 }
 0x4fb   :  { %1147 = vsyncpa [#allocation10], 1 }
 0x4fc   :  { %1148 = vsyncpa [#allocation13], 1 }
 0x4fd   :  { %1149 = vsyncpa [#allocation16], 1 }
 0x4fe   :  { %1150 = vsyncpa [#allocation5], 1 }
 0x4ff   :  { %1152 = vsyncpa [#allocation5 + $0x1], 1 }

</bundles_post_ra>
